<compile_context>
chip_gen: v5e
topology: v5e:2x2
jax: 0.10.0
libtpu: 0.0.40
codegen_flags: <defaults>
</compile_context>

<pallas_src>
import jax
import jax.numpy as jnp
from jax.experimental import pallas as pl
from jax.experimental.pallas import tpu as pltpu


def _round_up(x, m):
    return (x + m - 1) // m * m


# ------------------- prologue: projection + attention logits -----------------

def _proj_kernel(x_ref, w_ref, albdT_ref, arbd_ref, feat_ref, el_ref, er_ref):
    # feat' = X @ W for all heads at once: (N, in_dim) @ (in_dim, H*D)
    feat = jnp.dot(x_ref[...], w_ref[...], preferred_element_type=jnp.float32)
    feat_ref[...] = feat
    # er_i = <feat'_i, a_r> per head via block-diagonal matmul -> (N, H)
    er_ref[...] = jnp.dot(feat, arbd_ref[...],
                          preferred_element_type=jnp.float32)
    # el_j = <feat'_j, a_l> per head, lane-major over sources -> (H, N)
    el_ref[...] = jax.lax.dot_general(
        albdT_ref[...], feat, (((1,), (1,)), ((), ())),
        preferred_element_type=jnp.float32)


def _gat_proj(x, W, al_bdT, ar_bd, num_heads):
    N_pad, in_dim = x.shape
    HD = W.shape[1]
    return pl.pallas_call(
        _proj_kernel,
        out_shape=(
            jax.ShapeDtypeStruct((N_pad, HD), jnp.float32),
            jax.ShapeDtypeStruct((num_heads, N_pad), jnp.float32),
            jax.ShapeDtypeStruct((N_pad, num_heads), jnp.float32),
        ),
        grid=(1,),
        in_specs=[
            pl.BlockSpec((N_pad, in_dim), lambda i: (0, 0)),
            pl.BlockSpec((in_dim, HD), lambda i: (0, 0)),
            pl.BlockSpec((num_heads, HD), lambda i: (0, 0)),
            pl.BlockSpec((HD, num_heads), lambda i: (0, 0)),
        ],
        out_specs=(
            pl.BlockSpec((N_pad, HD), lambda i: (0, 0)),
            pl.BlockSpec((num_heads, N_pad), lambda i: (0, 0)),
            pl.BlockSpec((N_pad, num_heads), lambda i: (0, 0)),
        ),
    )(x, W, al_bdT, ar_bd)


# ----------------------- tiled attention / aggregation -----------------------

def _make_attn_kernel(num_heads, out_dim, negative_slope, apply_elu):
    def kernel(feat_ref, el_ref, er_ref, adj_ref, out_ref):
        mask = adj_ref[...] > 0                         # (TILE, N_pad) bool
        neg_inf = jnp.float32(-1e30)
        feat_all = feat_ref[...]                        # (N_pad, H*D)
        el_all = el_ref[...]                            # (H, N_pad)
        er_all = er_ref[...]                            # (TILE, H)

        for h in range(num_heads):                      # unrolled (H is tiny)
            feat_h = feat_all[:, h * out_dim:(h + 1) * out_dim]   # (N_pad, D)
            er = er_all[:, h:h + 1]                     # (TILE, 1) dests
            el = el_all[h:h + 1, :]                     # (1, N_pad) sources

            # e[i, j] = leaky_relu(er[i] + el[j]) on existing edges only.
            s = er + el                                 # (TILE, N_pad)
            s = jnp.where(s >= 0, s, negative_slope * s)
            s = jnp.where(mask, s, neg_inf)

            # masked softmax over incoming edges (src axis = -1) with
            # deferred normalization; masked entries underflow to exactly 0,
            # so no maskf temp/multiply is needed (self-loop invariant).
            m = jnp.max(s, axis=-1, keepdims=True)
            p = jnp.exp(s - m)                          # (TILE, N_pad)
            denom = jnp.maximum(jnp.sum(p, axis=-1, keepdims=True),
                                jnp.float32(1e-20))     # padded-row guard

            # out_i = (sum_j p[i,j] * feat_j) / denom[i]   (exact divide)
            out_h = jnp.dot(p, feat_h,
                            preferred_element_type=jnp.float32) / denom

            if apply_elu:
                out_h = jnp.where(out_h > 0, out_h, jnp.exp(out_h) - 1.0)

            # write each head directly into its lane slice of the output slab
            out_ref[:, h * out_dim:(h + 1) * out_dim] = out_h
    return kernel


def gat_conv(x_pad, adj_pad_i8, W, attn_l, attn_r, *, num_heads, out_dim,
             negative_slope, apply_elu, tile_dst=256):
    """One GATConv layer on padded inputs.

    x_pad: (N_pad, in_dim); adj_pad_i8: (N_pad, N_pad) int8, adj[dst, src];
    W: (in_dim, H*out_dim); attn_l/attn_r: (H, out_dim).
    Returns head-concatenated slab (N_pad, H*out_dim).
    """
    N_pad, _ = x_pad.shape
    HD = num_heads * out_dim

    # block-diagonal attention vectors (host-side, tiny)
    al_bdT = jnp.zeros((num_heads, HD), jnp.float32)
    ar_bd = jnp.zeros((HD, num_heads), jnp.float32)
    for h in range(num_heads):
        al_bdT = al_bdT.at[h, h * out_dim:(h + 1) * out_dim].set(attn_l[h])
        ar_bd = ar_bd.at[h * out_dim:(h + 1) * out_dim, h].set(attn_r[h])

    # prologue: projection + per-head logits, computed once per layer
    feat_all, el_all, er_all = _gat_proj(x_pad, W, al_bdT, ar_bd, num_heads)

    tile = min(tile_dst, N_pad)
    assert N_pad % tile == 0 and tile % 32 == 0, (N_pad, tile)
    kernel = _make_attn_kernel(num_heads, out_dim, negative_slope, apply_elu)

    return pl.pallas_call(
        kernel,
        out_shape=jax.ShapeDtypeStruct((N_pad, HD), jnp.float32),
        grid=(N_pad // tile,),
        in_specs=[
            pl.BlockSpec((N_pad, HD), lambda i: (0, 0)),         # feat (resident)
            pl.BlockSpec((num_heads, N_pad), lambda i: (0, 0)),  # el (resident)
            pl.BlockSpec((tile, num_heads), lambda i: (i, 0)),   # er dst tile
            pl.BlockSpec((tile, N_pad), lambda i: (i, 0)),       # adj dst tile
        ],
        out_specs=pl.BlockSpec((tile, HD), lambda i: (i, 0)),
        compiler_params=pltpu.CompilerParams(
            dimension_semantics=("parallel",)),
    )(feat_all, el_all, er_all, adj_pad_i8)


# ------------------------------ GAT forward ---------------------------------

def gat_forward(features, adj_i8, params, *, num_hidden, num_classes,
                heads, negative_slope=0.2, tile_dst=256):
    """GAT.forward: layer-0 (ELU, concat heads) -> layer-1 (mean over heads)."""
    N, in_dim = features.shape
    N_pad = _round_up(N, 128)

    # pad node axis to a lane-dense multiple of 128; padded src columns are
    # masked (zero adjacency), padded dst rows are sliced off at the end.
    x = jnp.zeros((N_pad, in_dim), features.dtype).at[:N].set(features)
    adj = jnp.zeros((N_pad, N_pad), jnp.int8).at[:N, :N].set(adj_i8)
    row_valid = (jnp.arange(N_pad) < N).astype(jnp.float32)[:, None]

    h = gat_conv(x, adj, params["W0"], params["al0"], params["ar0"],
                 num_heads=heads[0], out_dim=num_hidden,
                 negative_slope=negative_slope, apply_elu=True,
                 tile_dst=tile_dst)
    h = h * row_valid          # zero padded rows between layers (hygiene)
    out = gat_conv(h, adj, params["W1"], params["al1"], params["ar1"],
                   num_heads=heads[1], out_dim=num_classes,
                   negative_slope=negative_slope, apply_elu=False,
                   tile_dst=tile_dst)
    out = out[:N].reshape(N, heads[1], num_classes)
    return jnp.mean(out, axis=1)                       # mean over heads


# ---------------------------- pure-JAX reference -----------------------------

def _ref_gat_conv(x, adj, W, attn_l, attn_r, num_heads, out_dim,
                  negative_slope, apply_elu):
    N = x.shape[0]
    feat = (x @ W).reshape(N, num_heads, out_dim)            # (N, H, D)
    el = jnp.einsum("nhd,hd->hn", feat, attn_l)              # (H, N) sources
    er = jnp.einsum("nhd,hd->hn", feat, attn_r)              # (H, N) dests
    s = er[:, :, None] + el[:, None, :]                      # (H, Ndst, Nsrc)
    s = jnp.where(s >= 0, s, negative_slope * s)
    mask = (adj > 0)[None]
    s = jnp.where(mask, s, -1e30)
    p = jnp.exp(s - jnp.max(s, axis=-1, keepdims=True)) * mask
    alpha = p / jnp.sum(p, axis=-1, keepdims=True)
    out = jnp.einsum("hij,jhd->ihd", alpha, feat)            # (N, H, D)
    if apply_elu:
        out = jnp.where(out > 0, out, jnp.exp(out) - 1.0)
    return out


def _ref_forward(features, adj, params, num_hidden, num_classes, heads):
    h = _ref_gat_conv(features, adj, params["W0"], params["al0"],
                      params["ar0"], heads[0], num_hidden, 0.2, True)
    h = h.reshape(h.shape[0], -1)
    out = _ref_gat_conv(h, adj, params["W1"], params["al1"],
                        params["ar1"], heads[1], num_classes, 0.2, False)
    return jnp.mean(out, axis=1)


# --------------------------------- driver ------------------------------------

if __name__ == "__main__":
    key = jax.random.PRNGKey(0)

    # small synthetic "Cora-like" graph
    N = 64           # nodes
    in_dim = 16      # input feature dim
    num_hidden = 8
    num_classes = 4
    num_heads = 2
    num_out_heads = 1
    heads = [num_heads, num_out_heads]

    k_feat, k_adj, k_w0, k_a0l, k_a0r, k_w1, k_a1l, k_a1r = \
        jax.random.split(key, 8)

    features = jax.random.normal(k_feat, (N, in_dim), dtype=jnp.float32)

    # random sparse adjacency + self loops; adj[dst, src]
    adj_rand = (jax.random.uniform(k_adj, (N, N)) < 0.1).astype(jnp.float32)
    adj = jnp.maximum(adj_rand, jnp.eye(N, dtype=jnp.float32))
    adj_i8 = adj.astype(jnp.int8)          # compact adjacency for the kernel

    # deterministic parameter init (xavier-ish scaling)
    def init(k, shape, fan_in):
        return (jax.random.normal(k, shape, dtype=jnp.float32)
                / jnp.sqrt(jnp.float32(fan_in)))

    params = {
        "W0":  init(k_w0, (in_dim, num_heads * num_hidden), in_dim),
        "al0": init(k_a0l, (num_heads, num_hidden), num_hidden),
        "ar0": init(k_a0r, (num_heads, num_hidden), num_hidden),
        "W1":  init(k_w1, (num_heads * num_hidden,
                           num_out_heads * num_classes),
                    num_heads * num_hidden),
        "al1": init(k_a1l, (num_out_heads, num_classes), num_classes),
        "ar1": init(k_a1r, (num_out_heads, num_classes), num_classes),
    }

    # tile_dst=64 exercises a multi-step, parallel dst grid even at N_pad=128.
    out = gat_forward(features, adj_i8, params,
                      num_hidden=num_hidden, num_classes=num_classes,
                      heads=heads, tile_dst=64)
    out = jax.block_until_ready(out)
    assert out.shape == (N, num_classes), out.shape

    ref = jax.block_until_ready(
        _ref_forward(features, adj, params, num_hidden, num_classes, heads))
    assert jnp.allclose(out, ref, atol=1e-3, rtol=1e-3), \
        float(jnp.max(jnp.abs(out - ref)))

    print("KERNEL_OK")
</pallas_src>

<mosaic_0001>
module attributes {stable_mosaic.version = 11 : i64} {
  func.func @_proj_kernel(%arg0: i32, %arg1: memref<128x16xf32, #tpu.memory_space<vmem>>, %arg2: memref<16x16xf32, #tpu.memory_space<vmem>>, %arg3: memref<2x16xf32, #tpu.memory_space<vmem>>, %arg4: memref<16x2xf32, #tpu.memory_space<vmem>>, %arg5: memref<128x16xf32, #tpu.memory_space<vmem>>, %arg6: memref<2x128xf32, #tpu.memory_space<vmem>>, %arg7: memref<128x2xf32, #tpu.memory_space<vmem>>) attributes {dimension_semantics = [#tpu.dimension_semantics<arbitrary>], iteration_bounds = array<i64: 1>, scalar_prefetch = 0 : i64, scratch_operands = 0 : i64, tpu.core_type = #tpu.core_type<tc>, window_params = [{pipeline_mode = #tpu.pipeline_mode<synchronous>, transform_indices = @transform_0, window_bounds = array<i64: 128, 16>}, {pipeline_mode = #tpu.pipeline_mode<synchronous>, transform_indices = @transform_1, window_bounds = array<i64: 16, 16>}, {pipeline_mode = #tpu.pipeline_mode<synchronous>, transform_indices = @transform_2, window_bounds = array<i64: 2, 16>}, {pipeline_mode = #tpu.pipeline_mode<synchronous>, transform_indices = @transform_3, window_bounds = array<i64: 16, 2>}, {pipeline_mode = #tpu.pipeline_mode<synchronous>, transform_indices = @transform_4, window_bounds = array<i64: 128, 16>}, {pipeline_mode = #tpu.pipeline_mode<synchronous>, transform_indices = @transform_5, window_bounds = array<i64: 2, 128>}, {pipeline_mode = #tpu.pipeline_mode<synchronous>, transform_indices = @transform_6, window_bounds = array<i64: 128, 2>}]} {
    %c0 = arith.constant 0 : index
    %c0_0 = arith.constant 0 : index
    %0 = vector.load %arg1[%c0, %c0_0] : memref<128x16xf32, #tpu.memory_space<vmem>>, vector<128x16xf32>
    %c0_1 = arith.constant 0 : index
    %c0_2 = arith.constant 0 : index
    %1 = vector.load %arg2[%c0_1, %c0_2] : memref<16x16xf32, #tpu.memory_space<vmem>>, vector<16x16xf32>
    %cst = arith.constant dense<0.000000e+00> : vector<128x16xf32>
    %2 = tpu.matmul %0, %1, %cst {dimension_numbers = #tpu.dot_dimension_numbers<[1], [0], [0], [1], [0, 0, 1, 1], [], []>} : vector<128x16xf32>, vector<16x16xf32>, vector<128x16xf32> -> vector<128x16xf32>
    %c0_3 = arith.constant 0 : index
    %c0_4 = arith.constant 0 : index
    %3 = vector.load %arg5[%c0_3, %c0_4] : memref<128x16xf32, #tpu.memory_space<vmem>>, vector<128x16xf32>
    tpu.vector_store %arg5[%c0_3, %c0_4], %2 {strides = array<i32>} : memref<128x16xf32, #tpu.memory_space<vmem>>, vector<128x16xf32>,
    %c0_5 = arith.constant 0 : index
    %c0_6 = arith.constant 0 : index
    %4 = vector.load %arg4[%c0_5, %c0_6] : memref<16x2xf32, #tpu.memory_space<vmem>>, vector<16x2xf32>
    %cst_7 = arith.constant dense<0.000000e+00> : vector<128x2xf32>
    %5 = tpu.matmul %2, %4, %cst_7 {dimension_numbers = #tpu.dot_dimension_numbers<[1], [0], [0], [1], [0, 0, 1, 1], [], []>} : vector<128x16xf32>, vector<16x2xf32>, vector<128x2xf32> -> vector<128x2xf32>
    %c0_8 = arith.constant 0 : index
    %c0_9 = arith.constant 0 : index
    %6 = vector.load %arg7[%c0_8, %c0_9] : memref<128x2xf32, #tpu.memory_space<vmem>>, vector<128x2xf32>
    tpu.vector_store %arg7[%c0_8, %c0_9], %5 {strides = array<i32>} : memref<128x2xf32, #tpu.memory_space<vmem>>, vector<128x2xf32>,
    %c0_10 = arith.constant 0 : index
    %c0_11 = arith.constant 0 : index
    %7 = vector.load %arg3[%c0_10, %c0_11] : memref<2x16xf32, #tpu.memory_space<vmem>>, vector<2x16xf32>
    %cst_12 = arith.constant dense<0.000000e+00> : vector<2x128xf32>
    %8 = tpu.matmul %7, %2, %cst_12 {dimension_numbers = #tpu.dot_dimension_numbers<[1], [1], [0], [0], [0, 0, 1, 0], [], []>} : vector<2x16xf32>, vector<128x16xf32>, vector<2x128xf32> -> vector<2x128xf32>
    %c0_13 = arith.constant 0 : index
    %c0_14 = arith.constant 0 : index
    %9 = vector.load %arg6[%c0_13, %c0_14] : memref<2x128xf32, #tpu.memory_space<vmem>>, vector<2x128xf32>
    tpu.vector_store %arg6[%c0_13, %c0_14], %8 {strides = array<i32>} : memref<2x128xf32, #tpu.memory_space<vmem>>, vector<2x128xf32>,
    return
  }
  func.func @transform_0(%arg0: i32) -> (i32, i32) {
    %c0_i32 = arith.constant 0 : i32
    %c0_i32_0 = arith.constant 0 : i32
    %c0_i32_1 = arith.constant 0 : i32
    return %c0_i32, %c0_i32_0 : i32, i32
  }
  func.func @transform_1(%arg0: i32) -> (i32, i32) {
    %c0_i32 = arith.constant 0 : i32
    %c0_i32_0 = arith.constant 0 : i32
    %c0_i32_1 = arith.constant 0 : i32
    return %c0_i32, %c0_i32_0 : i32, i32
  }
  func.func @transform_2(%arg0: i32) -> (i32, i32) {
    %c0_i32 = arith.constant 0 : i32
    %c0_i32_0 = arith.constant 0 : i32
    %c0_i32_1 = arith.constant 0 : i32
    return %c0_i32, %c0_i32_0 : i32, i32
  }
  func.func @transform_3(%arg0: i32) -> (i32, i32) {
    %c0_i32 = arith.constant 0 : i32
    %c0_i32_0 = arith.constant 0 : i32
    %c0_i32_1 = arith.constant 0 : i32
    return %c0_i32, %c0_i32_0 : i32, i32
  }
  func.func @transform_4(%arg0: i32) -> (i32, i32) {
    %c0_i32 = arith.constant 0 : i32
    %c0_i32_0 = arith.constant 0 : i32
    %c0_i32_1 = arith.constant 0 : i32
    return %c0_i32, %c0_i32_0 : i32, i32
  }
  func.func @transform_5(%arg0: i32) -> (i32, i32) {
    %c0_i32 = arith.constant 0 : i32
    %c0_i32_0 = arith.constant 0 : i32
    %c0_i32_1 = arith.constant 0 : i32
    return %c0_i32, %c0_i32_0 : i32, i32
  }
  func.func @transform_6(%arg0: i32) -> (i32, i32) {
    %c0_i32 = arith.constant 0 : i32
    %c0_i32_0 = arith.constant 0 : i32
    %c0_i32_1 = arith.constant 0 : i32
    return %c0_i32, %c0_i32_0 : i32, i32
  }
}

</mosaic_0001>

<bundles_post_ra>
// kernel: tpu_custom_call.1
= control target key start
LH: loop header
LB: loop body
LE: loop exit
PB: predicated region body
PF: predicated region fallthrough
CT: control target
= control target key end

     0   :  { %vm39_vm0 = vcmask 130048   ;;  %s714_s0 = inlined_call_operand.vmem [shape: f32[128,16], index: 0, kind: input, shape index: {}]   ;;  %s715_s1 = inlined_call_operand.vmem [shape: f32[16,16], index: 1, kind: input, shape index: {}]   ;;  %s716_s2 = inlined_call_operand.vmem [shape: f32[2,16], index: 2, kind: input, shape index: {}]   ;;  %s717_s3 = inlined_call_operand.vmem [shape: f32[16,2], index: 3, kind: input, shape index: {}]   ;;  %s718_s4 = inlined_call_operand.vmem [shape: f32[128,16], index: 4, kind: output, shape index: {0}]   ;;  %s719_s5 = inlined_call_operand.hbm [shape: f32[2,128], index: 5, kind: output, shape index: {1}]   ;;  %s720_s6 = inlined_call_operand.vmem [shape: f32[128,2], index: 6, kind: output, shape index: {2}]  }
   0x1   :  { %v38_v0 = vld [vmem:[%s715_s1 + $0x8] sm:$0xff]  ;;  %v37_v1 = vld [vmem:[%s715_s1] sm:$0xff]  ;;  %v32_v3 = vld [vmem:[%s714_s0 + $0x58] sm:$0xff] }
   0x2   :  { %102 = vmatpush.msra.mxu0 %v38_v0  ;;  %399 = vmatpush.msra.mxu3 %v38_v0  ;;  %v21_v2 = vld [vmem:[%s714_s0] sm:$0xff] }
   0x4   :  { %103 = vmatpush.msra.mxu0 %v37_v1  ;;  %400 = vmatpush.msra.mxu3 %v37_v1 }
   0x5   :  { %350 = vmatmul.msk.f32.vlgmr.msra.gmra.mxu0 %vm39_vm0, %v21_v2  ;;  %361 = vmatmul.msk.f32.vlgmr.msra.gmra.mxu3 %vm39_vm0, %v32_v3 }
   0x6   :  { %12 = vsyncpa [#allocation3], 0  ;;  %v22_v4 = vld [vmem:[%s714_s0 + $0x8] sm:$0xff]  ;;  %v33_v5 = vld [vmem:[%s714_s0 + $0x60] sm:$0xff]  ;;  %vm284_vm1 = vcmask 15360   ;;  %s430_s18 = smov [#allocation2]  }
   0x7   :  { %v23_v6 = vld [vmem:[%s714_s0 + $0x10] sm:$0xff]  ;;  %v34_v7 = vld [vmem:[%s714_s0 + $0x68] sm:$0xff]  ;;  %v24_v8 = vld [vmem:[%s714_s0 + $0x18] sm:$0xff]  ;;  %s333_s19 = sshll.u32 %s430_s18, 4  ;;  %s335_s21 = sshll.u32 %s719_s5, 4  ;;  %s334_s19 = int_to_ptr.vmem [resolvable:$true] %s333_s19  ;;  %s336_s21 = int_to_ptr.hbm [resolvable:$true] %s335_s21 }
   0x8   :  { %v35_v9 = vld [vmem:[%s714_s0 + $0x70] sm:$0xff]  ;;  %v25_v10 = vld [vmem:[%s714_s0 + $0x20] sm:$0xff]  ;;  %v36_v11 = vld [vmem:[%s714_s0 + $0x78] sm:$0xff] }
   0x9   :  { %v26_v12 = vld [vmem:[%s714_s0 + $0x28] sm:$0xff]  ;;  %v27_v13 = vld [vmem:[%s714_s0 + $0x30] sm:$0xff]  ;;  %v28_v15 = vld [vmem:[%s714_s0 + $0x38] sm:$0xff] }
   0xa   :  { %v170_v14 = vld [vmem:[%s717_s3 + $0x8] sm:$0xff]  ;;  %v29_v16 = vld [vmem:[%s714_s0 + $0x40] sm:$0xff]  ;;  %v31_v18 = vld [vmem:[%s714_s0 + $0x50] sm:$0xff] }
   0xb   :  { %233 = vmatpush.msra.mxu1 %v170_v14  ;;  %401 = vmatpush.msrb.mxu3 %v170_v14  ;;  %v30_v17 = vld [vmem:[%s714_s0 + $0x48] sm:$0xff]  ;;  %v169_v19 = vld [vmem:[%s717_s3] sm:$0xff] }
   0xc   :  { %v301_v36 = vld [vmem:[%s716_s2] sm:$0x3] }
   0xd   :  { %351 = vmatmul.msk.f32.gmra.mxu0 %vm39_vm0, %v22_v4  ;;  %362 = vmatmul.msk.f32.gmra.mxu3 %vm39_vm0, %v33_v5 }
   0xe   :  { %234 = vmatpush.msra.mxu1 %v169_v19  ;;  %402 = vmatpush.msrb.mxu3 %v169_v19 }
  0x15   :  { %352 = vmatmul.msk.f32.gmra.mxu0 %vm39_vm0, %v23_v6  ;;  %363 = vmatmul.msk.f32.gmra.mxu3 %vm39_vm0, %v34_v7 }
  0x1d   :  { %353 = vmatmul.msk.f32.gmra.mxu0 %vm39_vm0, %v24_v8  ;;  %364 = vmatmul.msk.f32.gmra.mxu3 %vm39_vm0, %v35_v9 }
  0x25   :  { %354 = vmatmul.msk.f32.gmra.mxu0 %vm39_vm0, %v25_v10  ;;  %365 = vmatmul.msk.f32.gmra.mxu3 %vm39_vm0, %v36_v11 }
  0x2d   :  { %355 = vmatmul.msk.f32.gmra.mxu0 %vm39_vm0, %v26_v12 }
  0x35   :  { %356 = vmatmul.msk.f32.gmra.mxu0 %vm39_vm0, %v27_v13 }
  0x3d   :  { %357 = vmatmul.msk.f32.gmra.mxu0 %vm39_vm0, %v28_v15 }
  0x45   :  { %358 = vmatmul.msk.f32.gmra.mxu0 %vm39_vm0, %v29_v16 }
  0x4d   :  { %359 = vmatmul.msk.f32.gmra.mxu0 %vm39_vm0, %v30_v17 }
  0x55   :  { %360 = vmatmul.msk.f32.gmra.mxu0 %vm39_vm0, %v31_v18 }
  0x82   :  { %v542_v20 = vpop.f32.mrf.mxu0 }
  0x83   :  { %153 = vst.msk [vmem:[%s718_s4] sm:$0xff] %vm39_vm0, %v542_v20  ;;  %366 = vmatmul.msk.f32.vlgmr.msra.gmra.mxu1 %vm39_vm0, %v542_v20 }
  0x88   :  { %v138_v21 = vpop.f32.mrf.mxu3 }
  0x89   :  { %164 = vst.msk [vmem:[%s718_s4 + $0x58] sm:$0xff] %vm39_vm0, %v138_v21  ;;  %377 = vmatmul.msk.f32.vlgmr.msrb.gmra.mxu3 %vm39_vm0, %v138_v21 }
  0x8a   :  { %v108_v22 = vpop.f32.mrf.mxu0 }
  0x8b   :  { %154 = vst.msk [vmem:[%s718_s4 + $0x8] sm:$0xff] %vm39_vm0, %v108_v22  ;;  %367 = vmatmul.msk.f32.gmra.mxu1 %vm39_vm0, %v108_v22 }
  0x90   :  { %v141_v23 = vpop.f32.mrf.mxu3 }
  0x91   :  { %165 = vst.msk [vmem:[%s718_s4 + $0x60] sm:$0xff] %vm39_vm0, %v141_v23  ;;  %378 = vmatmul.msk.f32.gmra.mxu3 %vm39_vm0, %v141_v23 }
  0x92   :  { %v111_v24 = vpop.f32.mrf.mxu0 }
  0x93   :  { %155 = vst.msk [vmem:[%s718_s4 + $0x10] sm:$0xff] %vm39_vm0, %v111_v24  ;;  %368 = vmatmul.msk.f32.gmra.mxu1 %vm39_vm0, %v111_v24 }
  0x98   :  { %v144_v25 = vpop.f32.mrf.mxu3 }
  0x99   :  { %166 = vst.msk [vmem:[%s718_s4 + $0x68] sm:$0xff] %vm39_vm0, %v144_v25  ;;  %379 = vmatmul.msk.f32.gmra.mxu3 %vm39_vm0, %v144_v25 }
  0x9a   :  { %v114_v26 = vpop.f32.mrf.mxu0 }
  0x9b   :  { %156 = vst.msk [vmem:[%s718_s4 + $0x18] sm:$0xff] %vm39_vm0, %v114_v26  ;;  %369 = vmatmul.msk.f32.gmra.mxu1 %vm39_vm0, %v114_v26 }
  0xa0   :  { %v147_v27 = vpop.f32.mrf.mxu3 }
  0xa1   :  { %167 = vst.msk [vmem:[%s718_s4 + $0x70] sm:$0xff] %vm39_vm0, %v147_v27  ;;  %380 = vmatmul.msk.f32.gmra.mxu3 %vm39_vm0, %v147_v27 }
  0xa2   :  { %v117_v28 = vpop.f32.mrf.mxu0 }
  0xa3   :  { %157 = vst.msk [vmem:[%s718_s4 + $0x20] sm:$0xff] %vm39_vm0, %v117_v28  ;;  %370 = vmatmul.msk.f32.gmra.mxu1 %vm39_vm0, %v117_v28 }
  0xa8   :  { %v150_v29 = vpop.f32.mrf.mxu3 }
  0xa9   :  { %168 = vst.msk [vmem:[%s718_s4 + $0x78] sm:$0xff] %vm39_vm0, %v150_v29  ;;  %382 = vmatpush.xpose.msk.msra.mxu2 %vm39_vm0, %v150_v29  ;;  %381 = vmatmul.msk.f32.gmra.mxu3 %vm39_vm0, %v150_v29 }
  0xaa   :  { %v120_v30 = vpop.f32.mrf.mxu0 }
  0xab   :  { %158 = vst.msk [vmem:[%s718_s4 + $0x28] sm:$0xff] %vm39_vm0, %v120_v30  ;;  %371 = vmatmul.msk.f32.gmra.mxu1 %vm39_vm0, %v120_v30 }
  0xad   :  { %383 = vmatpush.xpose.msk.msra.mxu2 %vm39_vm0, %v147_v27 }
  0xb1   :  { %384 = vmatpush.xpose.msk.msra.mxu2 %vm39_vm0, %v144_v25 }
  0xb2   :  { %v123_v31 = vpop.f32.mrf.mxu0 }
  0xb3   :  { %159 = vst.msk [vmem:[%s718_s4 + $0x30] sm:$0xff] %vm39_vm0, %v123_v31  ;;  %372 = vmatmul.msk.f32.gmra.mxu1 %vm39_vm0, %v123_v31 }
  0xb5   :  { %385 = vmatpush.xpose.msk.msra.mxu2 %vm39_vm0, %v141_v23 }
  0xb9   :  { %386 = vmatpush.xpose.msk.msra.mxu2 %vm39_vm0, %v138_v21 }
  0xba   :  { %v126_v32 = vpop.f32.mrf.mxu0 }
  0xbb   :  { %160 = vst.msk [vmem:[%s718_s4 + $0x38] sm:$0xff] %vm39_vm0, %v126_v32  ;;  %373 = vmatmul.msk.f32.gmra.mxu1 %vm39_vm0, %v126_v32 }
  0xc2   :  { %v129_v33 = vpop.f32.mrf.mxu0 }
  0xc3   :  { %161 = vst.msk [vmem:[%s718_s4 + $0x40] sm:$0xff] %vm39_vm0, %v129_v33  ;;  %374 = vmatmul.msk.f32.gmra.mxu1 %vm39_vm0, %v129_v33 }
  0xca   :  { %v132_v34 = vpop.f32.mrf.mxu0 }
  0xcb   :  { %162 = vst.msk [vmem:[%s718_s4 + $0x48] sm:$0xff] %vm39_vm0, %v132_v34  ;;  %375 = vmatmul.msk.f32.gmra.mxu1 %vm39_vm0, %v132_v34 }
  0xd2   :  { %v135_v35 = vpop.f32.mrf.mxu0 }
  0xd3   :  { %163 = vst.msk [vmem:[%s718_s4 + $0x50] sm:$0xff] %vm39_vm0, %v135_v35  ;;  %376 = vmatmul.msk.f32.gmra.mxu1 %vm39_vm0, %v135_v35  ;;  %387 = vmatpush.xpose.msk.msra.mxu2 %vm39_vm0, %v135_v35 }
  0xd7   :  { %388 = vmatpush.xpose.msk.msra.mxu2 %vm39_vm0, %v132_v34 }
  0xdb   :  { %389 = vmatpush.xpose.msk.msra.mxu2 %vm39_vm0, %v129_v33 }
  0xdf   :  { %390 = vmatpush.xpose.msk.msra.mxu2 %vm39_vm0, %v126_v32 }
  0xe3   :  { %391 = vmatpush.xpose.msk.msra.mxu2 %vm39_vm0, %v123_v31 }
  0xe7   :  { %392 = vmatpush.xpose.msk.msra.mxu2 %vm39_vm0, %v120_v30 }
  0xeb   :  { %393 = vmatpush.xpose.msk.msra.mxu2 %vm39_vm0, %v117_v28 }
  0xef   :  { %394 = vmatpush.xpose.msk.msra.mxu2 %vm39_vm0, %v114_v26 }
  0xf3   :  { %395 = vmatpush.xpose.msk.msra.mxu2 %vm39_vm0, %v111_v24 }
  0xf7   :  { %396 = vmatpush.xpose.msk.msra.mxu2 %vm39_vm0, %v108_v22 }
  0xfb   :  { %397 = vmatpush.xpose.msk.msra.mxu2 %vm39_vm0, %v542_v20 }
  0xfe   :  { %398 = vmatmul.msk.f32.vlgmr.msra.gmra.mxu2 %vm39_vm0, %v301_v36 }
 0x100   :  { %v236_v37 = vpop.f32.mrf.mxu1 }
 0x101   :  { %285 = vst.msk [vmem:[%s720_s6] sm:$0xff] %vm284_vm1, %v236_v37 }
 0x108   :  { %v239_v38 = vpop.f32.mrf.mxu1 }
 0x109   :  { %286 = vst.msk [vmem:[%s720_s6 + $0x8] sm:$0xff] %vm284_vm1, %v239_v38 }
 0x10c   :  { %v269_v39 = vpop.f32.mrf.mxu3 }
 0x10d   :  { %296 = vst.msk [vmem:[%s720_s6 + $0x58] sm:$0xff] %vm284_vm1, %v269_v39 }
 0x110   :  { %v242_v40 = vpop.f32.mrf.mxu1 }
 0x111   :  { %287 = vst.msk [vmem:[%s720_s6 + $0x10] sm:$0xff] %vm284_vm1, %v242_v40 }
 0x114   :  { %v272_v41 = vpop.f32.mrf.mxu3 }
 0x115   :  { %297 = vst.msk [vmem:[%s720_s6 + $0x60] sm:$0xff] %vm284_vm1, %v272_v41 }
 0x118   :  { %v245_v42 = vpop.f32.mrf.mxu1 }
 0x119   :  { %288 = vst.msk [vmem:[%s720_s6 + $0x18] sm:$0xff] %vm284_vm1, %v245_v42 }
 0x11c   :  { %v275_v43 = vpop.f32.mrf.mxu3 }
 0x11d   :  { %298 = vst.msk [vmem:[%s720_s6 + $0x68] sm:$0xff] %vm284_vm1, %v275_v43 }
 0x120   :  { %v248_v44 = vpop.f32.mrf.mxu1 }
 0x121   :  { %289 = vst.msk [vmem:[%s720_s6 + $0x20] sm:$0xff] %vm284_vm1, %v248_v44 }
 0x124   :  { %v278_v45 = vpop.f32.mrf.mxu3 }
 0x125   :  { %299 = vst.msk [vmem:[%s720_s6 + $0x70] sm:$0xff] %vm284_vm1, %v278_v45 }
 0x128   :  { %v251_v46 = vpop.f32.mrf.mxu1 }
 0x129   :  { %290 = vst.msk [vmem:[%s720_s6 + $0x28] sm:$0xff] %vm284_vm1, %v251_v46 }
 0x12c   :  { %v281_v47 = vpop.f32.mrf.mxu3 }
 0x12d   :  { %300 = vst.msk [vmem:[%s720_s6 + $0x78] sm:$0xff] %vm284_vm1, %v281_v47 }
 0x130   :  { %v254_v48 = vpop.f32.mrf.mxu1 }
 0x131   :  { %291 = vst.msk [vmem:[%s720_s6 + $0x30] sm:$0xff] %vm284_vm1, %v254_v48 }
 0x138   :  { %v257_v49 = vpop.f32.mrf.mxu1 }
 0x139   :  { %292 = vst.msk [vmem:[%s720_s6 + $0x38] sm:$0xff] %vm284_vm1, %v257_v49 }
 0x140   :  { %v260_v50 = vpop.f32.mrf.mxu1 }
 0x141   :  { %293 = vst.msk [vmem:[%s720_s6 + $0x40] sm:$0xff] %vm284_vm1, %v260_v50 }
 0x148   :  { %v263_v51 = vpop.f32.mrf.mxu1 }
 0x149   :  { %294 = vst.msk [vmem:[%s720_s6 + $0x48] sm:$0xff] %vm284_vm1, %v263_v51 }
 0x150   :  { %v266_v52 = vpop.f32.mrf.mxu1 }
 0x151   :  { %295 = vst.msk [vmem:[%s720_s6 + $0x50] sm:$0xff] %vm284_vm1, %v266_v52 }
 0x181   :  { %v322_v53 = vpop.f32.mrf.mxu2 }
 0x182   :  { %325 = vst [vmem:[#allocation2] sm:$0x3] %v322_v53 }
 0x183   :  { %338 = dma.vmem_to_hbm [thread:$0]  %s334_s19, 32, %s336_s21, [#allocation3]  }
 0x184   :  { %428 = dma.done.wait [#allocation3], 32  }
 0x185   :  { %429 = vsyncadd [#allocation3], 4294967264 }
 0x186   :  { %349 = vsyncpa [#allocation3], 1 }

</bundles_post_ra>
